<compile_context>
chip_gen: v5e
topology: v5e:2x2
jax: 0.10.0
libtpu: 0.0.40
codegen_flags: <defaults>
</compile_context>

<pallas_src>
import jax
import jax.numpy as jnp
import numpy as np
from jax.experimental import pallas as pl
from jax.experimental.pallas import tpu as pltpu

LANE = 128


def _pick_tile_rows(rows, n_batch, cap=512):
    """Rows-per-block. cap=512 -> (1,4,512,128) f32 input block = 1 MiB."""
    if rows <= cap:
        tile = rows
        # With a tiny batch, expose >=2 grid steps so v7x's two TensorCores
        # engage and the double-buffer pipeline overlaps on v5e/v6e.
        if n_batch < 2 and rows >= 16 and rows % 8 == 0:
            half = rows // 2
            half -= half % 8
            if half >= 8:
                tile = half
        return tile
    return cap  # multiple of 8; ragged last block handled by the cdiv grid


def _fill_kernel(fill_ref, o_ref):
    # fill_ref: (1, 1) SMEM scalar; o_ref: (1, 1, tile_rows, 128) VMEM.
    o_ref[...] = jnp.full(o_ref.shape, fill_ref[0, 0], dtype=o_ref.dtype)


def _make_conv_kernel(C, min_v, max_v):
    def kernel(x_ref, p_ref, o_ref):
        # x_ref: (1, C, tile_rows, 128) VMEM
        # p_ref: (1, C+1)  SMEM  [w_0 .. w_{C-1}, bias]
        # Read the parameters once, before the channel loop.
        w = [p_ref[0, c] for c in range(C)]
        b = p_ref[0, C]
        acc = None
        for c in range(C):
            yc = x_ref[0, c]                                   # dense (rows,128) slab
            yc = jnp.minimum(jnp.maximum(yc, min_v), max_v)    # clamp_min, clamp_max
            term = w[c] * yc
            acc = term if acc is None else acc + term
        acc = acc + b
        o_ref[...] = jnp.maximum(acc, 0.0)[None, None, :, :]   # ReLU
    return kernel


def model_forward(x_nchw, weight, bias, min_value=0.0, max_value=0.0):
    """x_nchw: (N, C, H, W); weight: (1, C, 1, 1); bias: (1,).
    min_value / max_value mirror the module's clamp bounds (defaults: 0.0)."""
    N, C, H, W = x_nchw.shape
    HW = H * W
    hw_pad = ((HW + LANE - 1) // LANE) * LANE
    rows = hw_pad // LANE

    w = weight.reshape(C).astype(jnp.float32)
    b = bias.reshape(()).astype(jnp.float32)

    tile_rows = _pick_tile_rows(rows, N)
    grid = (N, pl.cdiv(rows, tile_rows))

    min_v = float(min_value)
    max_v = float(max_value)

    if min_v >= max_v:
        # clamp_min then clamp_max with min >= max -> clamp(x) == max_v everywhere,
        # so the output is the constant relu(sum(w)*max_v + bias): never read x.
        fill = jnp.maximum(jnp.sum(w) * jnp.float32(max_v) + b, 0.0).reshape(1, 1)
        out4d = pl.pallas_call(
            _fill_kernel,
            out_shape=jax.ShapeDtypeStruct((N, 1, rows, LANE), jnp.float32),
            grid_spec=pltpu.PrefetchScalarGridSpec(
                num_scalar_prefetch=0,
                grid=grid,
                in_specs=[pl.BlockSpec((1, 1), lambda n, t: (0, 0),
                                       memory_space=pltpu.MemorySpace.SMEM)],
                out_specs=pl.BlockSpec((1, 1, tile_rows, LANE),
                                       lambda n, t: (n, 0, t, 0)),
            ),
            compiler_params=pltpu.CompilerParams(
                dimension_semantics=("parallel", "parallel")),
        )(fill)
    else:
        # General path: dense (rows, 128) spatial slabs, VPU channel reduction.
        x3d = x_nchw.astype(jnp.float32).reshape(N, C, HW)     # free reshape
        if hw_pad != HW:
            x3d = jnp.pad(x3d, ((0, 0), (0, 0), (0, hw_pad - HW)))
        x4d = x3d.reshape(N, C, rows, LANE)                    # free reshape
        params = jnp.concatenate([w, b.reshape(1)]).reshape(1, C + 1)
        out4d = pl.pallas_call(
            _make_conv_kernel(C, min_v, max_v),
            out_shape=jax.ShapeDtypeStruct((N, 1, rows, LANE), jnp.float32),
            grid_spec=pltpu.PrefetchScalarGridSpec(
                num_scalar_prefetch=0,
                grid=grid,
                in_specs=[
                    pl.BlockSpec((1, C, tile_rows, LANE),
                                 lambda n, t: (n, 0, t, 0)),
                    pl.BlockSpec((1, C + 1), lambda n, t: (0, 0),
                                 memory_space=pltpu.MemorySpace.SMEM),
                ],
                out_specs=pl.BlockSpec((1, 1, tile_rows, LANE),
                                       lambda n, t: (n, 0, t, 0)),
            ),
            compiler_params=pltpu.CompilerParams(
                dimension_semantics=("parallel", "parallel")),
        )(x4d, params)

    out = out4d.reshape(N, 1, hw_pad)
    if hw_pad != HW:
        out = out[:, :, :HW]
    return out.reshape(N, 1, H, W)   # metadata-only when no padding occurred


def _reference(x, weight, bias, min_value=0.0, max_value=0.0):
    # torch order: clamp_min then clamp_max, then 1x1 conv, then ReLU.
    y = jnp.minimum(jnp.maximum(x, min_value), max_value)
    z = jnp.einsum("nchw,oc->nohw", y,
                   weight.reshape(weight.shape[0], weight.shape[1]))
    z = z + bias.reshape(1, -1, 1, 1)
    return jnp.maximum(z, 0.0)


if __name__ == "__main__":
    key = jax.random.PRNGKey(0)
    kx, kw, kb = jax.random.split(key, 3)

    # Small shapes consistent with the module (C_in=4 fixed by Conv2d(4, 1, 1)).
    N, C, H, W = 2, 4, 16, 16
    x = jax.random.normal(kx, (N, C, H, W), dtype=jnp.float32)
    weight = jax.random.normal(kw, (1, C, 1, 1), dtype=jnp.float32) * 0.5
    bias = jax.random.normal(kb, (1,), dtype=jnp.float32)

    # 1) Module defaults (min_value=False, max_value=False -> clamp(0, 0)):
    #    exercises the constant-fill fast path.
    out = jax.block_until_ready(model_forward(x, weight, bias))
    ref = _reference(x, weight, bias)
    np.testing.assert_allclose(np.asarray(out), np.asarray(ref), rtol=1e-5, atol=1e-5)
    assert out.shape == (N, 1, H, W)

    # 2) Non-degenerate clamp bounds: exercises the general data-dependent kernel.
    out2 = jax.block_until_ready(
        model_forward(x, weight, bias, min_value=-1.0, max_value=1.0))
    ref2 = _reference(x, weight, bias, min_value=-1.0, max_value=1.0)
    np.testing.assert_allclose(np.asarray(out2), np.asarray(ref2), rtol=1e-5, atol=1e-5)

    print("KERNEL_OK")
</pallas_src>

<mosaic_0001>
module attributes {stable_mosaic.version = 11 : i64} {
  func.func @_fill_kernel(%arg0: i32, %arg1: i32, %arg2: memref<1x1xf32, #tpu.memory_space<smem>>, %arg3: memref<1x1x2x128xf32, #tpu.memory_space<vmem>>) attributes {dimension_semantics = [#tpu.dimension_semantics<parallel>, #tpu.dimension_semantics<parallel>], iteration_bounds = array<i64: 2, 1>, scalar_prefetch = 0 : i64, scratch_operands = 0 : i64, tpu.core_type = #tpu.core_type<tc>, window_params = [{transform_indices = @transform_0, window_bounds = array<i64: 1, 1>}, {transform_indices = @transform_1, window_bounds = array<i64: 1, 1, 2, 128>}]} {
    %c0 = arith.constant 0 : index
    %c0_0 = arith.constant 0 : index
    %0 = memref.load %arg2[%c0, %c0_0] : memref<1x1xf32, #tpu.memory_space<smem>>
    %1 = vector.broadcast %0 : f32 to vector<1x1x2x128xf32>
    %c0_1 = arith.constant 0 : index
    %c0_2 = arith.constant 0 : index
    %c0_3 = arith.constant 0 : index
    %c0_4 = arith.constant 0 : index
    %2 = vector.load %arg3[%c0_1, %c0_2, %c0_3, %c0_4] : memref<1x1x2x128xf32, #tpu.memory_space<vmem>>, vector<1x1x2x128xf32>
    tpu.vector_store %arg3[%c0_1, %c0_2, %c0_3, %c0_4], %1 {strides = array<i32>} : memref<1x1x2x128xf32, #tpu.memory_space<vmem>>, vector<1x1x2x128xf32>,
    return
  }
  func.func @transform_0(%arg0: i32, %arg1: i32) -> (i32, i32) {
    %c0_i32 = arith.constant 0 : i32
    %c0_i32_0 = arith.constant 0 : i32
    %c0_i32_1 = arith.constant 0 : i32
    return %c0_i32, %c0_i32_0 : i32, i32
  }
  func.func @transform_1(%arg0: i32, %arg1: i32) -> (i32, i32, i32, i32) {
    %c0_i32 = arith.constant 0 : i32
    %c0_i32_0 = arith.constant 0 : i32
    %c0_i32_1 = arith.constant 0 : i32
    return %arg0, %c0_i32, %arg1, %c0_i32_0 : i32, i32, i32, i32
  }
}

</mosaic_0001>

<bundles_post_ra>
// kernel: tpu_custom_call.1
= control target key start
LH: loop header
LB: loop body
LE: loop exit
PB: predicated region body
PF: predicated region fallthrough
CT: control target
= control target key end

     0   :  { %s435_s0 = inlined_call_operand.<no memory space> [shape: f32[1,1], index: 0, kind: input, shape index: {}]   ;;  %s436_s1 = inlined_call_operand.hbm [shape: f32[2,1,2,128], index: 1, kind: output, shape index: {}]  }
   0x1   :  { %6 = sst [smem:[#allocation2]] %s435_s0 }
   0x2   :  { %7 = vsyncpa [#allocation4], 0 }
   0x3   :  { %9 = vsyncpa [#allocation4 + $0x1], 0  ;;  %s343_s8 = smov 0   ;;  %s345_s9 = smov 0  }
   0x4   :  { %s347_s10 = smov 0   ;;  %s349_s11 = smov 0  }
   0x5   :  { %s351_s12 = smov 0   ;;  %s353_s13 = smov 0  }
   0x6 LB: > { %s186_s0 = sadd.s32 4294967295, %s328_s13   ;;  %s187_s14 = sadd.s32 4294967294, %s328_s13   ;;  %s328_s13 = sphi %s353_s13, %s15_s13   ;;  %s324_s12 = sphi %s351_s12, %s443_s12   ;;  %s320_s11 = sphi %s349_s11, %s442_s11   ;;  %s316_s10 = sphi %s347_s10, %s441_s10   ;;  %s312_s9 = sphi %s345_s9, %s440_s9   ;;  %s308_s8 = sphi %s343_s8, %s439_s8  }
   0x7   : > { %s27_s15 = sadd.s32 1, %s324_s12  ;;  %s57_s16 = sadd.s32 1, %s316_s10 }
   0x8   : > { %p29_p0 = scmp.ge.s32.totalorder %s27_s15, 2  ;;  %p67_p1 = scmp.ne.s32.totalorder %s316_s10, %s312_s9 }
   0x9   : > { %p68_p2 = scmp.eq.s32.totalorder %s186_s0, 1  ;;  %p73_p3 = scmp.ne.s32.totalorder %s312_s9, %s308_s8 }
   0xa   : > { %s445_s15 = smov (%p29_p0, %s27_s15), 0  ;;  %p74_p5 = scmp.eq.s32.totalorder %s187_s14, 1 }
   0xb   : > { %p383_p4 = por %p68_p2, %p67_p1  ;;  %s52_s18 = ssub.s32 %s324_s12, %s445_s15 }
   0xc   : > { %p189_p6 = scmp.ge.s32.totalorder %s328_s13, 1  ;;  %p55_p7 = scmp.eq.s32.totalorder %s52_s18, 0 }
   0xd   : > { %p390_p8 = por %p74_p5, %p73_p3  ;;  %p95_p9 = scmp.lt.s32.totalorder %s328_s13, 3 }
   0xe   : > { %s396_s20 = scalar_select %p55_p7, %s316_s10, %s57_s16  }
   0xf   : > { %p96_p10 = pnand %p189_p6, %p95_p9 }
  0x10   : > { %s107_s21 = sand.u32 (!%p96_p10), 1, %s312_s9   ;;  %s110_s22 = sld [smem:[#allocation2]] (!%p96_p10) }
  0x11   : > { %99 = sbr.rel (%p96_p10) target bundleno = 33 (0x21), region = 24  ;;  %s190_s23 = sshll.u32 (!%p96_p10), %s107_s21, 1 }
  0x12   : > { %s192_s24 = sshll.u32 (!%p96_p10), %s320_s11, 1  ;;  %s109_s25 = scalar_lea.vmem (!%p96_p10), [#allocation3], %s190_s23 }
  0x13   : > { %s127_s26 = sshll.u32 (!%p96_p10), %s109_s25, 4  ;;  %s125_s29 = scalar_lea.hbm (!%p96_p10), %s436_s1, %s192_s24  ;;  %s128_s26 = int_to_ptr.vmem [resolvable:$true] %s127_s26 }
  0x14   : > { %s129_s30 = sshll.u32 (!%p96_p10), %s125_s29, 4  ;;  %s114_s2 = scalar_lea.sflag (!%p96_p10), [#allocation4], %s107_s21  ;;  %s130_s30 = int_to_ptr.hbm [resolvable:$true] %s129_s30 }
  0x15   : > { %s264_s3 = sshra.s32 (!%p96_p10), %s130_s30, 4  ;;  %s270_s7 = scalar_lea.hbm (!%p96_p10), %s436_s1, 4  ;;  %s265_s3 = int_to_ptr.hbm [resolvable:$true] %s264_s3 }
  0x16   : > { %v111_v0 = vstv %s110_s22  ;;  %s266_s4 = scalar_lea.hbm %s265_s3, 2  ;;  %p271_p0 = scmp.lt.s32.totalorder %s265_s3, %s436_s1 }
  0x17   : > { %112 = vst [vmem:[%s109_s25] sm:$0x3] %v111_v0  ;;  %p267_p11 = scmp.ne.s32.totalorder %s265_s3, %s266_s4  ;;  %p272_p1 = scmp.lt.s32.totalorder %s270_s7, %s266_s4 }
  0x19   : > { %p268_p12 = pnand %p267_p11, %p383_p4  ;;  %p273_p2 = por %p272_p1, %p271_p0 }
  0x1b   : > { %p269_p13 = pneg %p268_p12 }
  0x1d   : > { %p274_p3 = pnand %p273_p2, %p269_p13 }
  0x1f   : > { %277 = shalt.err (!%p274_p3)
}
  0x20   : > { %195 = dma.vmem_to_hbm [thread:$0]  (%p383_p4), %s128_s26, 32, %s130_s30, %s114_s2  }
  0x21 PF: > { %p201_p5 = scmp.ge.s32.totalorder %s328_s13, 2  ;;  %s141_s14 = sand.u32 1, %s308_s8  }
  0x22   : > { %s142_s16 = scalar_lea.sflag [#allocation4], %s141_s14 }
  0x23   : > { %p198_p6 = pnand %p201_p5, %p390_p8 }
  0x25   : > { %p199_p7 = pneg %p198_p6 }
  0x27   : > { %303 = dma.done.wait (%p199_p7), %s142_s16, 32  }
  0x28   : > { %305 = vsyncadd (%p199_p7), %s142_s16, 4294967264  ;;  %s15_s13 = sadd.s32 1, %s328_s13   ;;  %s439_s8 = smov %s312_s9 }
  0x29   : > { %p12_p9 = scmp.ge.s32.totalorder %s15_s13, 4   ;;  %s440_s9 = smov %s316_s10 }
  0x2a   : > { %s441_s10 = smov %s396_s20  ;;  %s442_s11 = smov %s324_s12 }
  0x2b   : > { %s443_s12 = smov %s445_s15  ;;  %14 = sbr.rel (!%p12_p9) target bundleno = 6 (0x6), region = 56 }
  0x30   :  { %148 = vsyncpa [#allocation4], 1 }
  0x31   :  { %150 = vsyncpa [#allocation4 + $0x1], 1 }

</bundles_post_ra>
